<compile_context>
chip_gen: v5e
topology: v5e:2x2
jax: 0.10.0
libtpu: 0.0.40
codegen_flags: <defaults>
</compile_context>

<pallas_src>
import functools

import jax
import jax.numpy as jnp
from jax.experimental import pallas as pl
from jax.experimental.pallas import tpu as pltpu

DROPOUT = 0.2
N_EMBD = 27
N_HEAD = 1
BLOCK_SIZE = 512  # max context of the original module; toy run below uses T=8


def _block_kernel(x_ref, ln1_g_ref, ln1_b_ref,
                  wq_ref, wk_ref, wv_ref, wp_ref, bp_ref,
                  ln2_g_ref, ln2_b_ref,
                  w1_ref, b1_ref, w2_ref, b2_ref,
                  wei_mask_ref, proj_mask_ref, ffn_mask_ref,
                  o_ref, *, head_size):
    f32 = jnp.float32
    bf16 = jnp.bfloat16

    x = x_ref[...].astype(f32)                        # (T, C)
    T = x.shape[0]

    def layer_norm(v, g_ref, b_ref):
        mu = jnp.mean(v, axis=-1, keepdims=True)
        var = jnp.mean(jnp.square(v - mu), axis=-1, keepdims=True)
        return (v - mu) * jax.lax.rsqrt(var + 1e-5) * g_ref[...] + b_ref[...]

    # ---- self-attention branch: x + Dropout(Proj(Attn(LN1(x)))) ----
    h = layer_norm(x, ln1_g_ref, ln1_b_ref)
    h16 = h.astype(bf16)
    q = jnp.dot(h16, wq_ref[...], preferred_element_type=f32)   # (T, HS)
    k = jnp.dot(h16, wk_ref[...], preferred_element_type=f32)
    v = jnp.dot(h16, wv_ref[...], preferred_element_type=f32)

    wei = jnp.dot(q.astype(bf16), k.astype(bf16).T,
                  preferred_element_type=f32) * (float(head_size) ** -0.5)
    row = jax.lax.broadcasted_iota(jnp.int32, (T, T), 0)
    col = jax.lax.broadcasted_iota(jnp.int32, (T, T), 1)
    wei = jnp.where(col <= row, wei, -jnp.inf)        # causal mask
    wei = wei - jnp.max(wei, axis=-1, keepdims=True)  # stable softmax (f32)
    wei = jnp.exp(wei)
    wei = wei / jnp.sum(wei, axis=-1, keepdims=True)
    wei = wei * wei_mask_ref[...]                     # attention-prob dropout

    attn = jnp.dot(wei.astype(bf16), v.astype(bf16), preferred_element_type=f32)
    proj = jnp.dot(attn.astype(bf16), wp_ref[...], preferred_element_type=f32)
    proj = (proj + bp_ref[...]) * proj_mask_ref[...]  # proj-output dropout
    x1 = x + proj                                     # residual 1

    # ---- feed-forward branch: x1 + Dropout(relu(LN2(x1) W1 + b1) W2 + b2) ----
    h2 = layer_norm(x1, ln2_g_ref, ln2_b_ref)
    f = jnp.dot(h2.astype(bf16), w1_ref[...], preferred_element_type=f32) + b1_ref[...]
    f = jnp.maximum(f, 0.0)
    f = jnp.dot(f.astype(bf16), w2_ref[...], preferred_element_type=f32) + b2_ref[...]
    f = f * ffn_mask_ref[...]                         # FFN dropout
    o_ref[...] = (x1 + f).astype(o_ref.dtype)         # residual 2


def block_forward(x, params, *, dropout_key=None, training=True):
    """x: (B, T, C) float32.  Returns (B, T, C) float32."""
    B, T, C = x.shape
    HS = params["wq"].shape[1]
    HID = params["w1"].shape[1]

    # Dropout keep-masks, pre-scaled by 1/(1-p), drawn outside the kernel.
    keep = 1.0 - DROPOUT
    if training:
        if dropout_key is None:
            dropout_key = jax.random.PRNGKey(0)
        kw, kp, kf = jax.random.split(dropout_key, 3)
        inv = jnp.float32(1.0 / keep)
        wei_mask = jax.random.bernoulli(kw, keep, (B, T, T)).astype(jnp.float32) * inv
        proj_mask = jax.random.bernoulli(kp, keep, (B, T, C)).astype(jnp.float32) * inv
        ffn_mask = jax.random.bernoulli(kf, keep, (B, T, C)).astype(jnp.float32) * inv
    else:
        wei_mask = jnp.ones((B, T, T), jnp.float32)
        proj_mask = jnp.ones((B, T, C), jnp.float32)
        ffn_mask = jnp.ones((B, T, C), jnp.float32)

    # bf16 matmul operands (f32 accumulation in-kernel) halve weight bytes moved.
    bf16 = jnp.bfloat16
    wq = params["wq"].astype(bf16)
    wk = params["wk"].astype(bf16)
    wv = params["wv"].astype(bf16)
    wp = params["wp"].astype(bf16)
    w1 = params["w1"].astype(bf16)
    w2 = params["w2"].astype(bf16)

    ln1_g = params["ln1_g"].reshape(1, C)
    ln1_b = params["ln1_b"].reshape(1, C)
    ln2_g = params["ln2_g"].reshape(1, C)
    ln2_b = params["ln2_b"].reshape(1, C)
    bp = params["bp"].reshape(1, C)
    b1 = params["b1"].reshape(1, HID)
    b2 = params["b2"].reshape(1, C)

    def per_batch(*dims):
        # one (squeezed) batch element per grid step; pipelined by Pallas
        return pl.BlockSpec((None,) + dims, lambda b: (b, 0, 0))

    def resident(shape):
        # constant index map -> weight stays VMEM-resident across grid steps
        return pl.BlockSpec(shape, lambda b: (0, 0))

    in_specs = [
        per_batch(T, C),                                            # x
        resident((1, C)), resident((1, C)),                         # ln1 g/b
        resident((C, HS)), resident((C, HS)), resident((C, HS)),    # wq wk wv
        resident((HS, C)), resident((1, C)),                        # proj W/b
        resident((1, C)), resident((1, C)),                         # ln2 g/b
        resident((C, HID)), resident((1, HID)),                     # ffn W1/b1
        resident((HID, C)), resident((1, C)),                       # ffn W2/b2
        per_batch(T, T),                                            # attn dropout mask
        per_batch(T, C),                                            # proj dropout mask
        per_batch(T, C),                                            # ffn dropout mask
    ]

    return pl.pallas_call(
        functools.partial(_block_kernel, head_size=HS),
        out_shape=jax.ShapeDtypeStruct((B, T, C), x.dtype),
        grid=(B,),
        in_specs=in_specs,
        out_specs=pl.BlockSpec((None, T, C), lambda b: (b, 0, 0)),
        compiler_params=pltpu.CompilerParams(
            dimension_semantics=("parallel",),   # megacore: shard batch over TCs
            vmem_limit_bytes=32 * 1024 * 1024,   # safe w.r.t. v7x's 64 MiB VMEM
        ),
    )(x, ln1_g, ln1_b, wq, wk, wv, wp, bp, ln2_g, ln2_b,
      w1, b1, w2, b2, wei_mask, proj_mask, ffn_mask)


def init_block_params(key, n_embd, n_head=1):
    """Init mirroring torch defaults (Linear: U(-1/sqrt(fan_in),+), LN: 1/0)."""
    hs = n_embd // n_head
    hid = 4 * n_embd
    ks = jax.random.split(key, 9)

    def lin(k, fan_in, shape):
        lim = 1.0 / (fan_in ** 0.5)
        return jax.random.uniform(k, shape, jnp.float32, -lim, lim)

    return dict(
        ln1_g=jnp.ones((n_embd,), jnp.float32),
        ln1_b=jnp.zeros((n_embd,), jnp.float32),
        wq=lin(ks[0], n_embd, (n_embd, hs)),
        wk=lin(ks[1], n_embd, (n_embd, hs)),
        wv=lin(ks[2], n_embd, (n_embd, hs)),
        wp=lin(ks[3], hs * n_head, (hs * n_head, n_embd)),
        bp=lin(ks[4], hs * n_head, (n_embd,)),
        ln2_g=jnp.ones((n_embd,), jnp.float32),
        ln2_b=jnp.zeros((n_embd,), jnp.float32),
        w1=lin(ks[5], n_embd, (n_embd, hid)),
        b1=lin(ks[6], n_embd, (hid,)),
        w2=lin(ks[7], hid, (hid, n_embd)),
        b2=lin(ks[8], hid, (n_embd,)),
    )


def _block_ref(x, p):
    """Pure-JAX reference of Block.forward in eval mode (dropout = identity)."""
    def ln(v, g, b):
        mu = v.mean(-1, keepdims=True)
        var = jnp.square(v - mu).mean(-1, keepdims=True)
        return (v - mu) / jnp.sqrt(var + 1e-5) * g + b

    B, T, C = x.shape
    h = ln(x, p["ln1_g"], p["ln1_b"])
    q = h @ p["wq"]
    k = h @ p["wk"]
    v = h @ p["wv"]
    wei = (q @ jnp.swapaxes(k, -1, -2)) * (p["wk"].shape[-1] ** -0.5)
    causal = jnp.tril(jnp.ones((T, T), dtype=bool))
    wei = jnp.where(causal, wei, -jnp.inf)
    wei = jax.nn.softmax(wei, axis=-1)
    x1 = x + (wei @ v) @ p["wp"] + p["bp"]
    h2 = ln(x1, p["ln2_g"], p["ln2_b"])
    f = jnp.maximum(h2 @ p["w1"] + p["b1"], 0.0) @ p["w2"] + p["b2"]
    return x1 + f


if __name__ == "__main__":
    key = jax.random.PRNGKey(0)
    k_x, k_p, k_drop = jax.random.split(key, 3)

    B, T = 2, 8
    x = jax.random.normal(k_x, (B, T, N_EMBD), dtype=jnp.float32)
    params = init_block_params(k_p, N_EMBD, N_HEAD)

    # Training mode (dropout active) — the nn.Module default.
    y_train = block_forward(x, params, dropout_key=k_drop, training=True)
    y_train = jax.block_until_ready(y_train)

    # Eval mode (dropout = identity): compare against the pure-JAX reference
    # (loose tolerance: the kernel uses bf16 matmul operands, the ref is f32).
    y_eval = block_forward(x, params, training=False)
    y_eval = jax.block_until_ready(y_eval)
    y_ref = _block_ref(x, params)

    assert y_train.shape == (B, T, N_EMBD)
    assert y_eval.shape == (B, T, N_EMBD)
    assert bool(jnp.all(jnp.isfinite(y_train)))
    max_err = float(jnp.max(jnp.abs(y_eval - y_ref)))
    assert jnp.allclose(y_eval, y_ref, atol=1e-1, rtol=1e-1), max_err
    print("KERNEL_OK")
</pallas_src>

<mosaic_0001>
module attributes {stable_mosaic.version = 11 : i64} {
  func.func @_block_kernel(%arg0: i32, %arg1: memref<1x8x27xf32, #tpu.memory_space<vmem>>, %arg2: memref<1x27xf32, #tpu.memory_space<vmem>>, %arg3: memref<1x27xf32, #tpu.memory_space<vmem>>, %arg4: memref<27x27xbf16, #tpu.memory_space<vmem>>, %arg5: memref<27x27xbf16, #tpu.memory_space<vmem>>, %arg6: memref<27x27xbf16, #tpu.memory_space<vmem>>, %arg7: memref<27x27xbf16, #tpu.memory_space<vmem>>, %arg8: memref<1x27xf32, #tpu.memory_space<vmem>>, %arg9: memref<1x27xf32, #tpu.memory_space<vmem>>, %arg10: memref<1x27xf32, #tpu.memory_space<vmem>>, %arg11: memref<27x108xbf16, #tpu.memory_space<vmem>>, %arg12: memref<1x108xf32, #tpu.memory_space<vmem>>, %arg13: memref<108x27xbf16, #tpu.memory_space<vmem>>, %arg14: memref<1x27xf32, #tpu.memory_space<vmem>>, %arg15: memref<1x8x8xf32, #tpu.memory_space<vmem>>, %arg16: memref<1x8x27xf32, #tpu.memory_space<vmem>>, %arg17: memref<1x8x27xf32, #tpu.memory_space<vmem>>, %arg18: memref<1x8x27xf32, #tpu.memory_space<vmem>>) attributes {dimension_semantics = [#tpu.dimension_semantics<parallel>], iteration_bounds = array<i64: 2>, scalar_prefetch = 0 : i64, scratch_operands = 0 : i64, tpu.core_type = #tpu.core_type<tc>, window_params = [{transform_indices = @transform_0, window_bounds = array<i64: 1, 8, 27>}, {pipeline_mode = #tpu.pipeline_mode<synchronous>, transform_indices = @transform_1, window_bounds = array<i64: 1, 27>}, {pipeline_mode = #tpu.pipeline_mode<synchronous>, transform_indices = @transform_2, window_bounds = array<i64: 1, 27>}, {pipeline_mode = #tpu.pipeline_mode<synchronous>, transform_indices = @transform_3, window_bounds = array<i64: 27, 27>}, {pipeline_mode = #tpu.pipeline_mode<synchronous>, transform_indices = @transform_4, window_bounds = array<i64: 27, 27>}, {pipeline_mode = #tpu.pipeline_mode<synchronous>, transform_indices = @transform_5, window_bounds = array<i64: 27, 27>}, {pipeline_mode = #tpu.pipeline_mode<synchronous>, transform_indices = @transform_6, window_bounds = array<i64: 27, 27>}, {pipeline_mode = #tpu.pipeline_mode<synchronous>, transform_indices = @transform_7, window_bounds = array<i64: 1, 27>}, {pipeline_mode = #tpu.pipeline_mode<synchronous>, transform_indices = @transform_8, window_bounds = array<i64: 1, 27>}, {pipeline_mode = #tpu.pipeline_mode<synchronous>, transform_indices = @transform_9, window_bounds = array<i64: 1, 27>}, {pipeline_mode = #tpu.pipeline_mode<synchronous>, transform_indices = @transform_10, window_bounds = array<i64: 27, 108>}, {pipeline_mode = #tpu.pipeline_mode<synchronous>, transform_indices = @transform_11, window_bounds = array<i64: 1, 108>}, {pipeline_mode = #tpu.pipeline_mode<synchronous>, transform_indices = @transform_12, window_bounds = array<i64: 108, 27>}, {pipeline_mode = #tpu.pipeline_mode<synchronous>, transform_indices = @transform_13, window_bounds = array<i64: 1, 27>}, {transform_indices = @transform_14, window_bounds = array<i64: 1, 8, 8>}, {transform_indices = @transform_15, window_bounds = array<i64: 1, 8, 27>}, {transform_indices = @transform_16, window_bounds = array<i64: 1, 8, 27>}, {transform_indices = @transform_17, window_bounds = array<i64: 1, 8, 27>}]} {
    %c0 = arith.constant 0 : index
    %c0_0 = arith.constant 0 : index
    %c0_1 = arith.constant 0 : index
    %0 = vector.load %arg1[%c0, %c0_0, %c0_1] : memref<1x8x27xf32, #tpu.memory_space<vmem>>, vector<1x8x27xf32>
    %1 = vector.shape_cast %0 : vector<1x8x27xf32> to vector<8x27xf32>
    %cst = arith.constant dense<0.000000e+00> : vector<8xf32>
    %2 = vector.multi_reduction <add>, %1, %cst [1] : vector<8x27xf32> to vector<8xf32>
    %3 = vector.shape_cast %2 : vector<8xf32> to vector<8x1xf32>
    %cst_2 = arith.constant 2.700000e+01 : f32
    %4 = vector.broadcast %cst_2 : f32 to vector<8x1xf32>
    %5 = arith.divf %3, %4 : vector<8x1xf32>
    %6 = vector.broadcast %5 : vector<8x1xf32> to vector<8x27xf32>
    %7 = arith.subf %1, %6 : vector<8x27xf32>
    %8 = arith.mulf %7, %7 : vector<8x27xf32>
    %cst_3 = arith.constant dense<0.000000e+00> : vector<8xf32>
    %9 = vector.multi_reduction <add>, %8, %cst_3 [1] : vector<8x27xf32> to vector<8xf32>
    %10 = vector.shape_cast %9 : vector<8xf32> to vector<8x1xf32>
    %cst_4 = arith.constant 2.700000e+01 : f32
    %11 = vector.broadcast %cst_4 : f32 to vector<8x1xf32>
    %12 = arith.divf %10, %11 : vector<8x1xf32>
    %13 = vector.broadcast %5 : vector<8x1xf32> to vector<8x27xf32>
    %14 = arith.subf %1, %13 : vector<8x27xf32>
    %cst_5 = arith.constant 9.99999974E-6 : f32
    %15 = vector.broadcast %cst_5 : f32 to vector<8x1xf32>
    %16 = arith.addf %12, %15 : vector<8x1xf32>
    %17 = math.rsqrt %16 : vector<8x1xf32>
    %18 = vector.broadcast %17 : vector<8x1xf32> to vector<8x27xf32>
    %19 = arith.mulf %14, %18 : vector<8x27xf32>
    %c0_6 = arith.constant 0 : index
    %c0_7 = arith.constant 0 : index
    %20 = vector.load %arg2[%c0_6, %c0_7] : memref<1x27xf32, #tpu.memory_space<vmem>>, vector<1x27xf32>
    %21 = vector.broadcast %20 : vector<1x27xf32> to vector<8x27xf32>
    %22 = arith.mulf %19, %21 : vector<8x27xf32>
    %c0_8 = arith.constant 0 : index
    %c0_9 = arith.constant 0 : index
    %23 = vector.load %arg3[%c0_8, %c0_9] : memref<1x27xf32, #tpu.memory_space<vmem>>, vector<1x27xf32>
    %24 = vector.broadcast %23 : vector<1x27xf32> to vector<8x27xf32>
    %25 = arith.addf %22, %24 : vector<8x27xf32>
    %26 = arith.truncf %25 : vector<8x27xf32> to vector<8x27xbf16>
    %c0_10 = arith.constant 0 : index
    %c0_11 = arith.constant 0 : index
    %27 = vector.load %arg4[%c0_10, %c0_11] : memref<27x27xbf16, #tpu.memory_space<vmem>>, vector<27x27xbf16>
    %cst_12 = arith.constant dense<0.000000e+00> : vector<8x27xf32>
    %28 = tpu.matmul %26, %27, %cst_12 {dimension_numbers = #tpu.dot_dimension_numbers<[1], [0], [0], [1], [0, 0, 1, 1], [], []>} : vector<8x27xbf16>, vector<27x27xbf16>, vector<8x27xf32> -> vector<8x27xf32>
    %c0_13 = arith.constant 0 : index
    %c0_14 = arith.constant 0 : index
    %29 = vector.load %arg5[%c0_13, %c0_14] : memref<27x27xbf16, #tpu.memory_space<vmem>>, vector<27x27xbf16>
    %cst_15 = arith.constant dense<0.000000e+00> : vector<8x27xf32>
    %30 = tpu.matmul %26, %29, %cst_15 {dimension_numbers = #tpu.dot_dimension_numbers<[1], [0], [0], [1], [0, 0, 1, 1], [], []>} : vector<8x27xbf16>, vector<27x27xbf16>, vector<8x27xf32> -> vector<8x27xf32>
    %c0_16 = arith.constant 0 : index
    %c0_17 = arith.constant 0 : index
    %31 = vector.load %arg6[%c0_16, %c0_17] : memref<27x27xbf16, #tpu.memory_space<vmem>>, vector<27x27xbf16>
    %cst_18 = arith.constant dense<0.000000e+00> : vector<8x27xf32>
    %32 = tpu.matmul %26, %31, %cst_18 {dimension_numbers = #tpu.dot_dimension_numbers<[1], [0], [0], [1], [0, 0, 1, 1], [], []>} : vector<8x27xbf16>, vector<27x27xbf16>, vector<8x27xf32> -> vector<8x27xf32>
    %33 = arith.truncf %28 : vector<8x27xf32> to vector<8x27xbf16>
    %34 = arith.truncf %30 : vector<8x27xf32> to vector<8x27xbf16>
    %35 = tpu.transpose %34, [1, 0] : vector<8x27xbf16> -> vector<27x8xbf16>
    %cst_19 = arith.constant dense<0.000000e+00> : vector<8x8xf32>
    %36 = tpu.matmul %33, %35, %cst_19 {dimension_numbers = #tpu.dot_dimension_numbers<[1], [0], [0], [1], [0, 0, 1, 1], [], []>} : vector<8x27xbf16>, vector<27x8xbf16>, vector<8x8xf32> -> vector<8x8xf32>
    %cst_20 = arith.constant 0.192450091 : f32
    %37 = vector.broadcast %cst_20 : f32 to vector<8x8xf32>
    %38 = arith.mulf %36, %37 : vector<8x8xf32>
    %39 = tpu.iota {dimensions = array<i32: 0>} : vector<8x8xi32>
    %40 = tpu.iota {dimensions = array<i32: 1>} : vector<8x8xi32>
    %41 = arith.cmpi sle, %40, %39 : vector<8x8xi32>
    %cst_21 = arith.constant 0xFF800000 : f32
    %42 = vector.broadcast %cst_21 : f32 to vector<8x8xf32>
    %43 = arith.select %41, %38, %42 : vector<8x8xi1>, vector<8x8xf32>
    %cst_22 = arith.constant dense<0xFF800000> : vector<8xf32>
    %44 = vector.multi_reduction <maximumf>, %43, %cst_22 [1] : vector<8x8xf32> to vector<8xf32>
    %45 = vector.shape_cast %44 : vector<8xf32> to vector<8x1xf32>
    %46 = vector.broadcast %45 : vector<8x1xf32> to vector<8x8xf32>
    %47 = arith.subf %43, %46 : vector<8x8xf32>
    %48 = math.exp %47 : vector<8x8xf32>
    %cst_23 = arith.constant dense<0.000000e+00> : vector<8xf32>
    %49 = vector.multi_reduction <add>, %48, %cst_23 [1] : vector<8x8xf32> to vector<8xf32>
    %50 = vector.shape_cast %49 : vector<8xf32> to vector<8x1xf32>
    %51 = vector.broadcast %50 : vector<8x1xf32> to vector<8x8xf32>
    %52 = arith.divf %48, %51 : vector<8x8xf32>
    %c0_24 = arith.constant 0 : index
    %c0_25 = arith.constant 0 : index
    %c0_26 = arith.constant 0 : index
    %53 = vector.load %arg15[%c0_24, %c0_25, %c0_26] : memref<1x8x8xf32, #tpu.memory_space<vmem>>, vector<1x8x8xf32>
    %54 = vector.shape_cast %53 : vector<1x8x8xf32> to vector<8x8xf32>
    %55 = arith.mulf %52, %54 : vector<8x8xf32>
    %56 = arith.truncf %55 : vector<8x8xf32> to vector<8x8xbf16>
    %57 = arith.truncf %32 : vector<8x27xf32> to vector<8x27xbf16>
    %cst_27 = arith.constant dense<0.000000e+00> : vector<8x27xf32>
    %58 = tpu.matmul %56, %57, %cst_27 {dimension_numbers = #tpu.dot_dimension_numbers<[1], [0], [0], [1], [0, 0, 1, 1], [], []>} : vector<8x8xbf16>, vector<8x27xbf16>, vector<8x27xf32> -> vector<8x27xf32>
    %59 = arith.truncf %58 : vector<8x27xf32> to vector<8x27xbf16>
    %c0_28 = arith.constant 0 : index
    %c0_29 = arith.constant 0 : index
    %60 = vector.load %arg7[%c0_28, %c0_29] : memref<27x27xbf16, #tpu.memory_space<vmem>>, vector<27x27xbf16>
    %cst_30 = arith.constant dense<0.000000e+00> : vector<8x27xf32>
    %61 = tpu.matmul %59, %60, %cst_30 {dimension_numbers = #tpu.dot_dimension_numbers<[1], [0], [0], [1], [0, 0, 1, 1], [], []>} : vector<8x27xbf16>, vector<27x27xbf16>, vector<8x27xf32> -> vector<8x27xf32>
    %c0_31 = arith.constant 0 : index
    %c0_32 = arith.constant 0 : index
    %62 = vector.load %arg8[%c0_31, %c0_32] : memref<1x27xf32, #tpu.memory_space<vmem>>, vector<1x27xf32>
    %63 = vector.broadcast %62 : vector<1x27xf32> to vector<8x27xf32>
    %64 = arith.addf %61, %63 : vector<8x27xf32>
    %c0_33 = arith.constant 0 : index
    %c0_34 = arith.constant 0 : index
    %c0_35 = arith.constant 0 : index
    %65 = vector.load %arg16[%c0_33, %c0_34, %c0_35] : memref<1x8x27xf32, #tpu.memory_space<vmem>>, vector<1x8x27xf32>
    %66 = vector.shape_cast %65 : vector<1x8x27xf32> to vector<8x27xf32>
    %67 = arith.mulf %64, %66 : vector<8x27xf32>
    %68 = arith.addf %1, %67 : vector<8x27xf32>
    %cst_36 = arith.constant dense<0.000000e+00> : vector<8xf32>
    %69 = vector.multi_reduction <add>, %68, %cst_36 [1] : vector<8x27xf32> to vector<8xf32>
    %70 = vector.shape_cast %69 : vector<8xf32> to vector<8x1xf32>
    %cst_37 = arith.constant 2.700000e+01 : f32
    %71 = vector.broadcast %cst_37 : f32 to vector<8x1xf32>
    %72 = arith.divf %70, %71 : vector<8x1xf32>
    %73 = vector.broadcast %72 : vector<8x1xf32> to vector<8x27xf32>
    %74 = arith.subf %68, %73 : vector<8x27xf32>
    %75 = arith.mulf %74, %74 : vector<8x27xf32>
    %cst_38 = arith.constant dense<0.000000e+00> : vector<8xf32>
    %76 = vector.multi_reduction <add>, %75, %cst_38 [1] : vector<8x27xf32> to vector<8xf32>
    %77 = vector.shape_cast %76 : vector<8xf32> to vector<8x1xf32>
    %cst_39 = arith.constant 2.700000e+01 : f32
    %78 = vector.broadcast %cst_39 : f32 to vector<8x1xf32>
    %79 = arith.divf %77, %78 : vector<8x1xf32>
    %80 = vector.broadcast %72 : vector<8x1xf32> to vector<8x27xf32>
    %81 = arith.subf %68, %80 : vector<8x27xf32>
    %cst_40 = arith.constant 9.99999974E-6 : f32
    %82 = vector.broadcast %cst_40 : f32 to vector<8x1xf32>
    %83 = arith.addf %79, %82 : vector<8x1xf32>
    %84 = math.rsqrt %83 : vector<8x1xf32>
    %85 = vector.broadcast %84 : vector<8x1xf32> to vector<8x27xf32>
    %86 = arith.mulf %81, %85 : vector<8x27xf32>
    %c0_41 = arith.constant 0 : index
    %c0_42 = arith.constant 0 : index
    %87 = vector.load %arg9[%c0_41, %c0_42] : memref<1x27xf32, #tpu.memory_space<vmem>>, vector<1x27xf32>
    %88 = vector.broadcast %87 : vector<1x27xf32> to vector<8x27xf32>
    %89 = arith.mulf %86, %88 : vector<8x27xf32>
    %c0_43 = arith.constant 0 : index
    %c0_44 = arith.constant 0 : index
    %90 = vector.load %arg10[%c0_43, %c0_44] : memref<1x27xf32, #tpu.memory_space<vmem>>, vector<1x27xf32>
    %91 = vector.broadcast %90 : vector<1x27xf32> to vector<8x27xf32>
    %92 = arith.addf %89, %91 : vector<8x27xf32>
    %93 = arith.truncf %92 : vector<8x27xf32> to vector<8x27xbf16>
    %c0_45 = arith.constant 0 : index
    %c0_46 = arith.constant 0 : index
    %94 = vector.load %arg11[%c0_45, %c0_46] : memref<27x108xbf16, #tpu.memory_space<vmem>>, vector<27x108xbf16>
    %cst_47 = arith.constant dense<0.000000e+00> : vector<8x108xf32>
    %95 = tpu.matmul %93, %94, %cst_47 {dimension_numbers = #tpu.dot_dimension_numbers<[1], [0], [0], [1], [0, 0, 1, 1], [], []>} : vector<8x27xbf16>, vector<27x108xbf16>, vector<8x108xf32> -> vector<8x108xf32>
    %c0_48 = arith.constant 0 : index
    %c0_49 = arith.constant 0 : index
    %96 = vector.load %arg12[%c0_48, %c0_49] : memref<1x108xf32, #tpu.memory_space<vmem>>, vector<1x108xf32>
    %97 = vector.broadcast %96 : vector<1x108xf32> to vector<8x108xf32>
    %98 = arith.addf %95, %97 : vector<8x108xf32>
    %cst_50 = arith.constant 0.000000e+00 : f32
    %99 = vector.broadcast %cst_50 : f32 to vector<8x108xf32>
    %100 = arith.maximumf %98, %99 : vector<8x108xf32>
    %101 = arith.truncf %100 : vector<8x108xf32> to vector<8x108xbf16>
    %c0_51 = arith.constant 0 : index
    %c0_52 = arith.constant 0 : index
    %102 = vector.load %arg13[%c0_51, %c0_52] : memref<108x27xbf16, #tpu.memory_space<vmem>>, vector<108x27xbf16>
    %cst_53 = arith.constant dense<0.000000e+00> : vector<8x27xf32>
    %103 = tpu.matmul %101, %102, %cst_53 {dimension_numbers = #tpu.dot_dimension_numbers<[1], [0], [0], [1], [0, 0, 1, 1], [], []>} : vector<8x108xbf16>, vector<108x27xbf16>, vector<8x27xf32> -> vector<8x27xf32>
    %c0_54 = arith.constant 0 : index
    %c0_55 = arith.constant 0 : index
    %104 = vector.load %arg14[%c0_54, %c0_55] : memref<1x27xf32, #tpu.memory_space<vmem>>, vector<1x27xf32>
    %105 = vector.broadcast %104 : vector<1x27xf32> to vector<8x27xf32>
    %106 = arith.addf %103, %105 : vector<8x27xf32>
    %c0_56 = arith.constant 0 : index
    %c0_57 = arith.constant 0 : index
    %c0_58 = arith.constant 0 : index
    %107 = vector.load %arg17[%c0_56, %c0_57, %c0_58] : memref<1x8x27xf32, #tpu.memory_space<vmem>>, vector<1x8x27xf32>
    %108 = vector.shape_cast %107 : vector<1x8x27xf32> to vector<8x27xf32>
    %109 = arith.mulf %106, %108 : vector<8x27xf32>
    %110 = arith.addf %68, %109 : vector<8x27xf32>
    %c0_59 = arith.constant 0 : index
    %c0_60 = arith.constant 0 : index
    %c0_61 = arith.constant 0 : index
    %111 = vector.load %arg18[%c0_59, %c0_60, %c0_61] : memref<1x8x27xf32, #tpu.memory_space<vmem>>, vector<1x8x27xf32>
    %112 = vector.shape_cast %111 : vector<1x8x27xf32> to vector<8x27xf32>
    %113 = vector.shape_cast %110 : vector<8x27xf32> to vector<1x8x27xf32>
    tpu.vector_store %arg18[%c0_59, %c0_60, %c0_61], %113 {strides = array<i32>} : memref<1x8x27xf32, #tpu.memory_space<vmem>>, vector<1x8x27xf32>,
    return
  }
  func.func @transform_0(%arg0: i32) -> (i32, i32, i32) {
    %c0_i32 = arith.constant 0 : i32
    %c0_i32_0 = arith.constant 0 : i32
    %c0_i32_1 = arith.constant 0 : i32
    return %arg0, %c0_i32, %c0_i32_0 : i32, i32, i32
  }
  func.func @transform_1(%arg0: i32) -> (i32, i32) {
    %c0_i32 = arith.constant 0 : i32
    %c0_i32_0 = arith.constant 0 : i32
    %c0_i32_1 = arith.constant 0 : i32
    return %c0_i32, %c0_i32_0 : i32, i32
  }
  func.func @transform_2(%arg0: i32) -> (i32, i32) {
    %c0_i32 = arith.constant 0 : i32
    %c0_i32_0 = arith.constant 0 : i32
    %c0_i32_1 = arith.constant 0 : i32
    return %c0_i32, %c0_i32_0 : i32, i32
  }
  func.func @transform_3(%arg0: i32) -> (i32, i32) {
    %c0_i32 = arith.constant 0 : i32
    %c0_i32_0 = arith.constant 0 : i32
    %c0_i32_1 = arith.constant 0 : i32
    return %c0_i32, %c0_i32_0 : i32, i32
  }
  func.func @transform_4(%arg0: i32) -> (i32, i32) {
    %c0_i32 = arith.constant 0 : i32
    %c0_i32_0 = arith.constant 0 : i32
    %c0_i32_1 = arith.constant 0 : i32
    return %c0_i32, %c0_i32_0 : i32, i32
  }
  func.func @transform_5(%arg0: i32) -> (i32, i32) {
    %c0_i32 = arith.constant 0 : i32
    %c0_i32_0 = arith.constant 0 : i32
    %c0_i32_1 = arith.constant 0 : i32
    return %c0_i32, %c0_i32_0 : i32, i32
  }
  func.func @transform_6(%arg0: i32) -> (i32, i32) {
    %c0_i32 = arith.constant 0 : i32
    %c0_i32_0 = arith.constant 0 : i32
    %c0_i32_1 = arith.constant 0 : i32
    return %c0_i32, %c0_i32_0 : i32, i32
  }
  func.func @transform_7(%arg0: i32) -> (i32, i32) {
    %c0_i32 = arith.constant 0 : i32
    %c0_i32_0 = arith.constant 0 : i32
    %c0_i32_1 = arith.constant 0 : i32
    return %c0_i32, %c0_i32_0 : i32, i32
  }
  func.func @transform_8(%arg0: i32) -> (i32, i32) {
    %c0_i32 = arith.constant 0 : i32
    %c0_i32_0 = arith.constant 0 : i32
    %c0_i32_1 = arith.constant 0 : i32
    return %c0_i32, %c0_i32_0 : i32, i32
  }
  func.func @transform_9(%arg0: i32) -> (i32, i32) {
    %c0_i32 = arith.constant 0 : i32
    %c0_i32_0 = arith.constant 0 : i32
    %c0_i32_1 = arith.constant 0 : i32
    return %c0_i32, %c0_i32_0 : i32, i32
  }
  func.func @transform_10(%arg0: i32) -> (i32, i32) {
    %c0_i32 = arith.constant 0 : i32
    %c0_i32_0 = arith.constant 0 : i32
    %c0_i32_1 = arith.constant 0 : i32
    return %c0_i32, %c0_i32_0 : i32, i32
  }
  func.func @transform_11(%arg0: i32) -> (i32, i32) {
    %c0_i32 = arith.constant 0 : i32
    %c0_i32_0 = arith.constant 0 : i32
    %c0_i32_1 = arith.constant 0 : i32
    return %c0_i32, %c0_i32_0 : i32, i32
  }
  func.func @transform_12(%arg0: i32) -> (i32, i32) {
    %c0_i32 = arith.constant 0 : i32
    %c0_i32_0 = arith.constant 0 : i32
    %c0_i32_1 = arith.constant 0 : i32
    return %c0_i32, %c0_i32_0 : i32, i32
  }
  func.func @transform_13(%arg0: i32) -> (i32, i32) {
    %c0_i32 = arith.constant 0 : i32
    %c0_i32_0 = arith.constant 0 : i32
    %c0_i32_1 = arith.constant 0 : i32
    return %c0_i32, %c0_i32_0 : i32, i32
  }
  func.func @transform_14(%arg0: i32) -> (i32, i32, i32) {
    %c0_i32 = arith.constant 0 : i32
    %c0_i32_0 = arith.constant 0 : i32
    %c0_i32_1 = arith.constant 0 : i32
    return %arg0, %c0_i32, %c0_i32_0 : i32, i32, i32
  }
  func.func @transform_15(%arg0: i32) -> (i32, i32, i32) {
    %c0_i32 = arith.constant 0 : i32
    %c0_i32_0 = arith.constant 0 : i32
    %c0_i32_1 = arith.constant 0 : i32
    return %arg0, %c0_i32, %c0_i32_0 : i32, i32, i32
  }
  func.func @transform_16(%arg0: i32) -> (i32, i32, i32) {
    %c0_i32 = arith.constant 0 : i32
    %c0_i32_0 = arith.constant 0 : i32
    %c0_i32_1 = arith.constant 0 : i32
    return %arg0, %c0_i32, %c0_i32_0 : i32, i32, i32
  }
  func.func @transform_17(%arg0: i32) -> (i32, i32, i32) {
    %c0_i32 = arith.constant 0 : i32
    %c0_i32_0 = arith.constant 0 : i32
    %c0_i32_1 = arith.constant 0 : i32
    return %arg0, %c0_i32, %c0_i32_0 : i32, i32, i32
  }
}

</mosaic_0001>

<bundles_post_ra>
// kernel: tpu_custom_call.1
= control target key start
LH: loop header
LB: loop body
LE: loop exit
PB: predicated region body
PF: predicated region fallthrough
CT: control target
= control target key end

     0   :  { %s2422_s0 = inlined_call_operand.vmem [shape: f32[2,8,27], index: 0, kind: input, shape index: {}]   ;;  %s2423_s1 = inlined_call_operand.hbm [shape: f32[1,27], index: 1, kind: input, shape index: {}]   ;;  %s2424_s2 = inlined_call_operand.hbm [shape: f32[1,27], index: 2, kind: input, shape index: {}]   ;;  %s2425_s3 = inlined_call_operand.vmem [shape: bf16[27,27], index: 3, kind: input, shape index: {}]   ;;  %s2426_s4 = inlined_call_operand.vmem [shape: bf16[27,27], index: 4, kind: input, shape index: {}]   ;;  %s2427_s5 = inlined_call_operand.vmem [shape: bf16[27,27], index: 5, kind: input, shape index: {}]   ;;  %s2428_s6 = inlined_call_operand.hbm [shape: bf16[27,27], index: 6, kind: input, shape index: {}]   ;;  %s2429_s7 = inlined_call_operand.hbm [shape: f32[1,27], index: 7, kind: input, shape index: {}]   ;;  %s2430_s8 = inlined_call_operand.hbm [shape: f32[1,27], index: 8, kind: input, shape index: {}]   ;;  %s2431_s9 = inlined_call_operand.hbm [shape: f32[1,27], index: 9, kind: input, shape index: {}]   ;;  %s2432_s10 = inlined_call_operand.vmem [shape: bf16[27,108], index: 10, kind: input, shape index: {}]   ;;  %s2433_s11 = inlined_call_operand.vmem [shape: f32[1,108], index: 11, kind: input, shape index: {}]   ;;  %s2434_s12 = inlined_call_operand.vmem [shape: bf16[108,27], index: 12, kind: input, shape index: {}]   ;;  %s2435_s13 = inlined_call_operand.vmem [shape: f32[1,27], index: 13, kind: input, shape index: {}]   ;;  %s2436_s14 = inlined_call_operand.hbm [shape: f32[2,8,8], index: 14, kind: input, shape index: {}]   ;;  %s2437_s15 = inlined_call_operand.hbm [shape: f32[2,8,27], index: 15, kind: input, shape index: {}]   ;;  %s2438_s16 = inlined_call_operand.hbm [shape: f32[2,8,27], index: 16, kind: input, shape index: {}]   ;;  %s2439_s17 = inlined_call_operand.hbm [shape: f32[2,8,27], index: 17, kind: output, shape index: {}]  }
   0x1   :  { %2453 = sst [smem:[#allocation30_spill]] %s2422_s0 }
   0x2   :  { %2454 = sst [smem:[#allocation31_spill]] %s2423_s1 }
   0x3   :  { %2455 = sst [smem:[#allocation32_spill]] %s2424_s2 }
   0x4   :  { %2456 = sst [smem:[#allocation33_spill]] %s2427_s5 }
   0x5   :  { %2457 = sst [smem:[#allocation34_spill]] %s2432_s10 }
   0x6   :  { %2458 = sst [smem:[#allocation35_spill]] %s2433_s11 }
   0x7   :  { %2459 = sst [smem:[#allocation36_spill]] %s2434_s12 }
   0x8   :  { %2460 = sst [smem:[#allocation37_spill]] %s2435_s13 }
   0x9   :  { %2461 = sst [smem:[#allocation38_spill]] %s2436_s14 }
   0xa   :  { %2462 = sst [smem:[#allocation39_spill]] %s2439_s17 }
   0xb   :  { %22 = vsyncpa [#allocation3], 0 }
   0xc   :  { %23 = vsyncpa [#allocation6], 0 }
   0xd   :  { %24 = vsyncpa [#allocation9], 0 }
   0xe   :  { %25 = vsyncpa [#allocation12], 0 }
   0xf   :  { %26 = vsyncpa [#allocation4], 0 }
  0x10   :  { %28 = vsyncpa [#allocation4 + $0x1], 0  ;;  %s2071_s24 = smov 0   ;;  %s2073_s25 = smov 0  }
  0x11   :  { %s2075_s26 = smov 0   ;;  %s2077_s27 = smov 0  }
  0x12 LB: > { %2463 = sst [smem:[#allocation23_spill]] %s1957_s24  ;;  %s2095_s18 = sadd.s32 4294967295, %s1969_s27   ;;  %s1969_s27 = sphi %s2077_s27, %s2500_s27   ;;  %s1965_s26 = sphi %s2075_s26, %s2502_s26   ;;  %s1961_s25 = sphi %s2073_s25, %s2504_s25   ;;  %s1957_s24 = sphi %s2071_s24, %s2503_s24  }
  0x13   : > { %2464 = sst [smem:[#allocation24_spill]] %s1965_s26  ;;  %p1356_p0 = scmp.ge.s32.totalorder %s1969_s27, 1 }
  0x14   : > { %2465 = sst [smem:[#allocation25_spill]] %s1969_s27  ;;  %p2451_p1 = scmp.eq.s32.totalorder %s2095_s18, 0 }
  0x15   : > { %s2466_s0 = sld [smem:[#allocation31_spill]]  ;;  %p442_p2 = scmp.lt.s32.totalorder %s1969_s27, 3 }
  0x16   : > { %s1971_s1 = smov [#allocation2]   ;;  %s1355_s22 = sadd.s32 4294967294, %s1969_s27  }
  0x17   : > { %p2100_p3 = pnand %p1356_p0, %p442_p2  ;;  %s456_s20 = sshll.u32 %s1971_s1, 4  ;;  %s457_s20 = int_to_ptr.vmem [resolvable:$true] %s456_s20 }
  0x18   : > { %s2117_s23 = sadd.s32 1, %s1969_s27   ;;  %s340_s28 = sadd.s32 1, %s1965_s26 }
  0x19   : > { %p1511_p5 = pneg %p2100_p3  ;;  %2469 = sst [smem:[#allocation26_spill]] %s2117_s23 }
  0x1a   : > { %s337_s29 = ssub.s32 %s1969_s27, %s2117_s23  ;;  %p347_p7 = scmp.ne.s32.totalorder %s1965_s26, %s1961_s25 }
  0x1b   : > { %s454_s30 = sshll.u32 %s2466_s0, 4  ;;  %p2109_p6 = pnand %p1511_p5, %p2451_p1  ;;  %s455_s30 = int_to_ptr.hbm [resolvable:$true] %s454_s30 }
  0x1c   : > { %p338_p8 = scmp.eq.s32.totalorder %s337_s29, 0  ;;  %p348_p9 = scmp.eq.s32.totalorder %s1969_s27, 0 }
  0x1d   : > { %1514 = dma.hbm_to_vmem [thread:$0]  (!%p2109_p6), %s455_s30, 16, %s457_s20, [#allocation3]  }
  0x1e   : > { %p353_p10 = scmp.ne.s32.totalorder %s1961_s25, %s1957_s24  ;;  %p429_p11 = scmp.eq.s32.totalorder %s2095_s18, 1 }
  0x1f   : > { %s2129_s0 = scalar_select %p338_p8, %s1965_s26, %s340_s28  }
  0x20   : > { %p2131_p12 = por %p348_p9, %p347_p7  ;;  %p2137_p13 = por %p2451_p1, %p353_p10 }
  0x21   : > { %2470 = sst [smem:[#allocation27_spill]] %s2129_s0  ;;  %p2141_p0 = por %p429_p11, %p347_p7 }
  0x22   : > { %p435_p2 = scmp.eq.s32.totalorder %s1355_s22, 1  ;;  %p1550_p5 = scmp.lt.s32.totalorder %s1969_s27, 2 }
  0x23   : > { %s2473_s20 = scalar_select %p2141_p0, 1, 0 }
  0x24   : > { %s557_s29 = sand.u32 1, %s1969_s27   ;;  %p2147_p4 = por %p435_p2, %p353_p10 }
  0x25   : > { %2474 = sst [smem:[#allocation28_spill]] %s2473_s20  ;;  %s559_s0 = sand.u32 1, %s1965_s26  }
  0x26   : > { %s2475_s28 = scalar_select %p2147_p4, 1, 0 }
  0x27   : > { %s2153_s23 = sshll.u32 %s1969_s27, 3  ;;  %s2155_s24 = sshll.u32 %s559_s0, 3 }
  0x28   : > { %2476 = sst [smem:[#allocation29_spill]] %s2475_s28  ;;  %s561_s22 = scalar_lea.vmem [#allocation13], %s2155_s24 }
  0x29   : > { %s2477_s14 = sld [smem:[#allocation38_spill]]  ;;  %s569_s20 = sshll.u32 %s561_s22, 4  ;;  %s570_s20 = int_to_ptr.vmem [resolvable:$true] %s569_s20 }
  0x2a   : > { %p2164_p7 = pnand %p1550_p5, %p2131_p12  ;;  %s2479_s2 = sld [smem:[#allocation32_spill]] }
  0x2b   : > { %s2171_s13 = scalar_lea.sflag [#allocation3], %s557_s29 }
  0x2c   : > { %p1651_p9 = pneg %p2164_p7 }
  0x2f   : > { %s565_s11 = scalar_lea.hbm %s2477_s14, %s2153_s23  ;;  %s1654_s26 = scalar_lea.hbm %s2477_s14, 16 }
  0x30   : > { %s567_s12 = sshll.u32 %s565_s11, 4  ;;  %s466_s0 = sshll.u32 %s2479_s2, 4  ;;  %s568_s12 = int_to_ptr.hbm [resolvable:$true] %s567_s12  ;;  %s467_s0 = int_to_ptr.hbm [resolvable:$true] %s466_s0 }
  0x31   : > { %s1647_s17 = sshra.s32 %s568_s12, 4  ;;  %s1648_s17 = int_to_ptr.hbm [resolvable:$true] %s1647_s17 }
  0x32   : > { %s1649_s11 = scalar_lea.hbm %s1648_s17, 8  ;;  %p1655_p12 = scmp.lt.s32.totalorder %s1648_s17, %s2477_s14 }
  0x33   : > { %p1650_p8 = scmp.ne.s32.totalorder %s1648_s17, %s1649_s11  ;;  %p1656_p2 = scmp.lt.s32.totalorder %s1654_s26, %s1649_s11 }
  0x35   : > { %p1652_p10 = pnand %p1651_p9, %p1650_p8  ;;  %p1657_p5 = por %p1656_p2, %p1655_p12 }
  0x37   : > { %p1653_p11 = pneg %p1652_p10 }
  0x39   : > { %p1658_p1 = pnand %p1657_p5, %p1653_p11 }
  0x3b   : > { %1661 = shalt.err (!%p1658_p1)
}
  0x3c   : > { %1533 = dma.hbm_to_vmem [thread:$0]  (!%p2164_p7), %s568_s12, 128, %s570_s20, %s2171_s13  }
  0x3d   : > { %s1972_s29 = smov [#allocation5]   ;;  %s501_s5 = sshll.u32 %s2429_s7, 4  ;;  %s502_s5 = int_to_ptr.hbm [resolvable:$true] %s501_s5 }
  0x3e   : > { %s468_s2 = sshll.u32 %s1972_s29, 4  ;;  %s1973_s28 = smov [#allocation8]   ;;  %s469_s2 = int_to_ptr.vmem [resolvable:$true] %s468_s2 }
  0x3f   : > { %1517 = dma.hbm_to_vmem [thread:$0]  (!%p2109_p6), %s467_s0, 16, %s469_s2, [#allocation6]  }
  0x40   : > { %s503_s17 = sshll.u32 %s1973_s28, 4  ;;  %s584_s27 = scalar_lea.hbm %s2437_s15, %s2153_s23  ;;  %s504_s17 = int_to_ptr.vmem [resolvable:$true] %s503_s17 }
  0x41   : > { %s586_s14 = sshll.u32 %s584_s27, 4  ;;  %s580_s12 = scalar_lea.vmem [#allocation14], %s2155_s24  ;;  %s587_s14 = int_to_ptr.hbm [resolvable:$true] %s586_s14 }
  0x42   : > { %1523 = dma.hbm_to_vmem [thread:$0]  (!%p2109_p6), %s502_s5, 16, %s504_s17, [#allocation9]  }
  0x43   : > { %s588_s20 = sshll.u32 %s580_s12, 4  ;;  %s486_s22 = sshll.u32 %s2428_s6, 4  ;;  %s589_s20 = int_to_ptr.vmem [resolvable:$true] %s588_s20  ;;  %s487_s22 = int_to_ptr.hbm [resolvable:$true] %s486_s22 }
  0x44   : > { %s1737_s2 = sshra.s32 %s587_s14, 4  ;;  %s1744_s5 = scalar_lea.hbm %s2437_s15, 16  ;;  %s1738_s2 = int_to_ptr.hbm [resolvable:$true] %s1737_s2 }
  0x45   : > { %s1739_s0 = scalar_lea.hbm %s1738_s2, 8  ;;  %p1745_p11 = scmp.lt.s32.totalorder %s1738_s2, %s2437_s15 }
  0x46   : > { %p1740_p1 = scmp.ne.s32.totalorder %s1738_s2, %s1739_s0  ;;  %p1746_p12 = scmp.lt.s32.totalorder %s1744_s5, %s1739_s0 }
  0x48   : > { %p1742_p8 = pnand %p1740_p1, %p1651_p9  ;;  %p1747_p2 = por %p1746_p12, %p1745_p11 }
  0x4a   : > { %p1743_p10 = pneg %p1742_p8 }
  0x4c   : > { %p1748_p5 = pnand %p1747_p2, %p1743_p10 }
  0x4e   : > { %1751 = shalt.err (!%p1748_p5)
}
  0x4f   : > { %1536 = dma.hbm_to_vmem [thread:$0]  (!%p2164_p7), %s587_s14, 128, %s589_s20, %s2171_s13  }
  0x50   : > { %s1974_s27 = smov [#allocation7]   ;;  %s1975_s29 = smov 64  }
  0x51   : > { %s488_s12 = sshll.u32 %s1974_s27, 4  ;;  %s1976_s1 = smov 4   ;;  %s489_s12 = int_to_ptr.vmem [resolvable:$true] %s488_s12 }
  0x52   : > { %1520 = dma.hbm_to_vmem [thread:$0]  (!%p2109_p6), %s487_s22, 256, %s489_s12, [#allocation6], %s1975_s29, %s1975_s29, %s1976_s1  }
  0x53   : > { %s513_s28 = sshll.u32 %s2430_s8, 4  ;;  %s1977_s11 = smov [#allocation10]   ;;  %s514_s28 = int_to_ptr.hbm [resolvable:$true] %s513_s28 }
  0x54   : > { %s515_s5 = sshll.u32 %s1977_s11, 4  ;;  %s525_s17 = sshll.u32 %s2431_s9, 4  ;;  %s516_s5 = int_to_ptr.vmem [resolvable:$true] %s515_s5  ;;  %s526_s17 = int_to_ptr.hbm [resolvable:$true] %s525_s17 }
  0x55   : > { %1526 = dma.hbm_to_vmem [thread:$0]  (!%p2109_p6), %s514_s28, 16, %s516_s5, [#allocation9]  }
  0x56   : > { %s1978_s26 = smov [#allocation11]   ;;  %s603_s29 = scalar_lea.hbm %s2438_s16, %s2153_s23 }
  0x57   : > { %s527_s27 = sshll.u32 %s1978_s26, 4  ;;  %s605_s1 = sshll.u32 %s603_s29, 4  ;;  %s528_s27 = int_to_ptr.vmem [resolvable:$true] %s527_s27  ;;  %s606_s1 = int_to_ptr.hbm [resolvable:$true] %s605_s1 }
  0x58   : > { %1529 = dma.hbm_to_vmem [thread:$0]  (!%p2109_p6), %s526_s17, 16, %s528_s27, [#allocation12]  }
  0x59   : > { %s599_s2 = scalar_lea.vmem [#allocation15], %s2155_s24  ;;  %s1857_s11 = sshra.s32 %s606_s1, 4  ;;  %s1858_s11 = int_to_ptr.hbm [resolvable:$true] %s1857_s11 }
  0x5a   : > { %s607_s0 = sshll.u32 %s599_s2, 4  ;;  %s1859_s14 = scalar_lea.hbm %s1858_s11, 8  ;;  %s608_s0 = int_to_ptr.vmem [resolvable:$true] %s607_s0 }
  0x5b   : > { %p1860_p1 = scmp.ne.s32.totalorder %s1858_s11, %s1859_s14  ;;  %s1864_s20 = scalar_lea.hbm %s2438_s16, 16 }
  0x5c   : > { %p1865_p6 = scmp.lt.s32.totalorder %s1858_s11, %s2438_s16  ;;  %p1866_p11 = scmp.lt.s32.totalorder %s1864_s20, %s1859_s14 }
  0x5d   : > { %p1862_p8 = pnand %p1860_p1, %p1651_p9 }
  0x5e   : > { %p1867_p12 = por %p1866_p11, %p1865_p6 }
  0x5f   : > { %p1863_p10 = pneg %p1862_p8 }
  0x61   : > { %p1868_p2 = pnand %p1867_p12, %p1863_p10 }
  0x63   : > { %1871 = shalt.err (!%p1868_p2)
}
  0x64   : > { %1539 = dma.hbm_to_vmem [thread:$0]  (!%p2164_p7), %s606_s1, 128, %s608_s0, %s2171_s13  }
  0x65   : > { %616 = sbr.rel (%p2100_p3) target bundleno = 1748 (0x6d4), region = 88  ;;  %p2480_p9 = scmp.eq.s32.totalorder (!%p2100_p3), %s2095_s18, 0 }
  0x6a   : > { %1932 = dma.done.wait (%p2480_p9), [#allocation3], 16   ;;  %p2481_p5 = pmov %p2480_p9 }
  0x6c   : > { %1934 = vsyncadd (%p2481_p5), [#allocation3], 4294967280  ;;  %p2482_p1 = pmov %p2481_p5 }
  0x6e   : > { %1936 = dma.done.wait (%p2482_p1), [#allocation6], 272   ;;  %p2483_p8 = pmov %p2482_p1 }
  0x6f   : > { %p2484_p10 = pmov %p2482_p1 }
  0x70   : > { %1938 = vsyncadd (%p2483_p8), [#allocation6], 4294967024 }
  0x71   : > { %1940 = dma.done.wait (%p2484_p10), [#allocation9], 32   ;;  %p2485_p7 = pmov %p2482_p1 }
  0x72   : > { %p2486_p3 = pmov %p2482_p1 }
  0x73   : > { %1942 = vsyncadd (%p2485_p7), [#allocation9], 4294967264 }
  0x74   : > { %1944 = dma.done.wait (%p2486_p3), [#allocation12], 16   ;;  %p2487_p6 = pmov %p2482_p1 }
  0x75   : > { %s648_s10 = sand.u32 1, %s2095_s18   ;;  %s650_s24 = sand.u32 1, %s1961_s25  }
  0x76   : > { %1946 = vsyncadd (%p2487_p6), [#allocation12], 4294967280  ;;  %s2265_s19 = sshll.u32 %s650_s24, 3  ;;  %s649_s13 = scalar_lea.sflag [#allocation3], %s648_s10 }
  0x77   : > { %s652_s17 = scalar_lea.vmem [#allocation13], %s2265_s19 }
  0x78   : > { %1948 = dma.done.wait (%p2137_p13), %s649_s13, 384  }
  0x79   : > { %1950 = vsyncadd (%p2137_p13), %s649_s13, 4294966912  ;;  %p738_p11 = scmp.lt.s32.totalorder %s2095_s18, 1  ;;  %s2488_s29 = sld [smem:[#allocation30_spill]]  ;;  %vm744_vm0 = vcmask 220160   ;;  %v1979_v2 = vmov 27.0   ;;  %vm803_vm2 = vcmask 1044480   ;;  %v907_v59 = vlaneseq }
  0x7a   : > { %1607 = vrcp.f32 %v1979_v2  ;;  %v1388_v14 = vld [vmem:[%s2425_s3 + $0x8] sm:$0xf]  ;;  %v1463_v15 = vld [vmem:[%s2425_s3 + $0x8] sm:$0x30]  ;;  %vm804_vm3 = vcmask 1045504   ;;  %v1980_v17 = vmov 65535  }
  0x7b   : > { %s739_s26 = scalar_select %p738_p11, %s2095_s18, 1  ;;  %v1389_v16 = vor.u32 %v1463_v15, %v1388_v14  ;;  %v805_v18 = vsel %vm803_vm2, 4294967295, %v1980_v17  ;;  %v1397_v19 = vld [vmem:[%s2426_s4 + $0x8] sm:$0xf]  ;;  %v1465_v20 = vld [vmem:[%s2426_s4 + $0x8] sm:$0x30] }
  0x7c   : > { %v2299_v21 = vsel %vm804_vm3, %v805_v18, 0  ;;  %v1398_v22 = vor.u32 %v1465_v20, %v1397_v19  ;;  %s2489_s10 = sld [smem:[#allocation33_spill]]  ;;  %v1462_v29 = vld [vmem:[%s2425_s3] sm:$0xff]  ;;  %vm945_vm7 = vcmask 1043456   ;;  %v908_v60 = vshrl.u32 %v907_v59, 7  ;;  %s662_s2 = scalar_lea.vmem [#allocation14], %s2265_s19 }
  0x7d   : > { %s1381_s27 = sshll.u32 %s739_s26, 3  ;;  %v808_v25 = vand.u32 %v1389_v16, %v2299_v21  ;;  %v1464_v30 = vld [vmem:[%s2426_s4] sm:$0xff]  ;;  %v910_v61 = vand.u32 127, %v907_v59  ;;  %vm913_vm9 = vcmask 64512   ;;  %s2490_s11 = sld [smem:[#allocation34_spill]]  ;;  %vm1136_vm2 = vcmask 883712  }
  0x7e   : > { %v839_v27 = vand.u32 %v1398_v22, %v2299_v21  ;;  %v1600_v41 = vld [vmem:[#allocation2] ss:$0 sm:$0xff]  ;;  %v1601_v44 = vld [vmem:[#allocation5] ss:$0 sm:$0xff]  ;;  %v1468_v14 = vld [vmem:[#allocation7] sm:$0xff]  ;;  %s2491_s13 = sld [smem:[#allocation36_spill]] }
  0x7f   : > { %s741_s1 = scalar_lea.vmem %s2488_s29, %s1381_s27  ;;  %816 = vmatpush.bf16.msra.mxu0 %v808_v25  ;;  %vm911_vm8 = vcmp.le.s32.totalorder %v910_v61, %v908_v60  ;;  %s2492_s26 = sld [smem:[#allocation35_spill]] }
  0x80   : > { %v2277_v0 = vld [vmem:[%s741_s1] sm:$0xff]  ;;  %v1608_v3 = vpop.eup %1607  ;;  %847 = vmatpush.bf16.msra.mxu1 %v839_v27  ;;  %s1459_s27 = sshll.u32 %s2095_s18, 3  ;;  %s2493_s29 = sld [smem:[#allocation37_spill]] }
  0x81   : > { %v745_v1 = vsel %vm744_vm0, %v2277_v0, 0.0  ;;  %v749_v4 = vmul.f32 27.0, %v1608_v3  ;;  %vm753_vm1 = vweird.f32 %v1608_v3  ;;  %v938_v27 = vld [vmem:[%s652_s17] sm:$0xff]  ;;  %s672_s0 = scalar_lea.vmem [#allocation15], %s2265_s19  ;;  %s737_s28 = scalar_lea.vmem [#allocation16], %s2265_s19 }
  0x82   : > { %746 = vadd.xlane.f32.xlu0 %v745_v1  ;;  %v1406_v23 = vld [vmem:[%s2489_s10 + $0x8] sm:$0xf]  ;;  %v1467_v24 = vld [vmem:[%s2489_s10 + $0x8] sm:$0x30]  ;;  %v1466_v31 = vld [vmem:[%s2489_s10] sm:$0xff]  ;;  %s1173_s5 = sshll.u32 %s737_s28, 4  ;;  %s1174_s5 = int_to_ptr.vmem [resolvable:$true] %s1173_s5 }
  0x83   : > { %v750_v5 = vsub.f32 1.0, %v749_v4  ;;  %v1407_v26 = vor.u32 %v1467_v24, %v1406_v23  ;;  %817 = vmatpush.bf16.msra.mxu0 %v1462_v29  ;;  %s1161_s18 = scalar_lea.sflag [#allocation4], %s650_s24 }
  0x84   : > { %848 = vmatpush.bf16.msra.mxu1 %v1464_v30 }
  0x85   : > { %v751_v6 = vmul.f32 %v1608_v3, %v750_v5  ;;  %v870_v28 = vand.u32 %v1407_v26, %v2299_v21 }
  0x87   : > { %v752_v7 = vadd.f32 %v1608_v3, %v751_v6  ;;  %878 = vmatpush.bf16.msra.mxu2 %v870_v28 }
  0x89   : > { %v2281_v8 = vsel %vm753_vm1, %v1608_v3, %v752_v7 }
  0x8b   : > { %879 = vmatpush.bf16.msra.mxu2 %v1466_v31 }
  0xf5   : > { %v747_v9 = vpop.xlane.xlu0 %746 }
  0xf6   : > { %v755_v10 = vmul.f32 %v2281_v8, %v747_v9 }
  0xf8   : > { %v756_v11 = vsub.f32 %v2277_v0, %v755_v10  ;;  %v1417_v10 = vld [vmem:[#allocation7 + $0x8] sm:$0xf] }
  0xfa   : > { %v757_v12 = vmul.f32 %v756_v11, %v756_v11 }
  0xfc   : > { %v758_v13 = vsel %vm744_vm0, %v757_v12, 0.0 }
  0xfd   : > { %759 = vadd.xlane.f32.xlu0 %v758_v13 }
 0x170   : > { %v760_v32 = vpop.xlane.xlu0 %759 }
 0x171   : > { %v761_v33 = vmul.f32 %v760_v32, %v2281_v8 }
 0x173   : > { %v762_v34 = vadd.f32 1e-05, %v761_v33 }
 0x175   : > { %1609 = vrsqrt.f32 %v762_v34  ;;  %vm769_vm5 = vweird.f32 %v762_v34 }
 0x17b   : > { %v1610_v35 = vpop.eup %1609 }
 0x17c   : > { %v764_v36 = vmul.f32 %v1610_v35, %v762_v34  ;;  %vm770_vm4 = vweird.f32 %v1610_v35  ;;  %v1602_v34 = vld [vmem:[#allocation8] ss:$0 sm:$0xff] }
 0x17d   : > { %vm771_vm6 = vmor %vm769_vm5, %vm770_vm4 }
 0x17e   : > { %v765_v37 = vmul.f32 %v1610_v35, %v764_v36  ;;  %v1001_v36 = vld [vmem:[%s662_s2] sm:$0xff]  ;;  %s2494_s2 = sld [smem:[#allocation39_spill]] }
 0x180   : > { %v766_v38 = vmul.f32 0.5, %v765_v37 }
 0x182   : > { %v767_v39 = vsub.f32 1.5, %v766_v38 }
 0x184   : > { %v768_v40 = vmul.f32 %v1610_v35, %v767_v39  ;;  %s1171_s17 = scalar_lea.hbm %s2494_s2, %s1459_s27  ;;  %s1907_s27 = scalar_lea.hbm %s2494_s2, 16 }
 0x185   : > { %s1175_s20 = sshll.u32 %s1171_s17, 4  ;;  %s1176_s20 = int_to_ptr.hbm [resolvable:$true] %s1175_s20 }
 0x186   : > { %v772_v42 = vsel %vm771_vm6, %v1610_v35, %v768_v40  ;;  %s1901_s23 = sshra.s32 %s1176_s20, 4  ;;  %s1902_s23 = int_to_ptr.hbm [resolvable:$true] %s1901_s23 }
 0x187   : > { %v773_v43 = vmul.f32 %v772_v42, %v756_v11  ;;  %v1469_v11 = vld [vmem:[#allocation7 + $0x8] sm:$0x30]  ;;  %s1903_s21 = scalar_lea.hbm %s1902_s23, 8  ;;  %p1908_p9 = scmp.lt.s32.totalorder %s1902_s23, %s2494_s2 }
 0x188   : > { %v1418_v12 = vor.u32 %v1469_v11, %v1417_v10  ;;  %v1473_v11 = vld [vmem:[%s2491_s13 + $0x8] sm:$0xff]  ;;  %p1904_p13 = scmp.ne.s32.totalorder %s1902_s23, %s1903_s21  ;;  %p1909_p5 = scmp.lt.s32.totalorder %s1907_s27, %s1903_s21 }
 0x189   : > { %v778_v45 = vmul.f32 %v1600_v41, %v773_v43 }
 0x18a   : > { %v986_v13 = vand.u32 %v1418_v12, %v2299_v21  ;;  %v1472_v12 = vld [vmem:[%s2491_s13] sm:$0xff]  ;;  %p1905_p12 = pnand %p1904_p13, %p2141_p0  ;;  %p1910_p1 = por %p1909_p5, %p1908_p9 }
 0x18b   : > { %v783_v46 = vadd.f32 %v1601_v44, %v778_v45 }
 0x18c   : > { %994 = vmatpush.bf16.msrb.mxu1 %v986_v13  ;;  %v1605_v13 = vld [vmem:[%s2492_s26] ss:$0 sm:$0xff]  ;;  %p1906_p2 = pneg %p1905_p12 }
 0x18d   : > { %v784_v47 = vpack.c.bf16 %v783_v46, %v783_v46 }
 0x18e   : > { %p1911_p8 = pnand %p1910_p1, %p1906_p2 }
 0x18f   : > { %1390 = vmatmul.msk.bf16.vlgmr.msra.gmra.mxu0 %vm744_vm0, %v784_v47  ;;  %1399 = vmatmul.msk.bf16.vlgmr.msra.gmra.mxu1 %vm744_vm0, %v784_v47 }
 0x190   : > { %1408 = vmatmul.msk.bf16.vlgmr.msra.gmra.mxu2 %vm744_vm0, %v784_v47  ;;  %995 = vmatpush.bf16.msrb.mxu1 %v1468_v14  ;;  %v1426_v47 = vld [vmem:[%s2490_s11 + $0x8] sm:$0xf] }
 0x20c   : > { %v819_v48 = vpop.f32.mrf.mxu0  ;;  %v850_v49 = vpop.f32.mrf.mxu1 }
 0x20d   : > { %v886_v50 = vpack.c.bf16 %v850_v49, %v850_v49  ;;  %v885_v56 = vpack.c.bf16 %v819_v48, %v819_v48 }
 0x20f   : > { %v891_v51 = vsel %vm744_vm0, %v886_v50, 0  ;;  %v1470_v50 = vld [vmem:[%s2490_s11] sm:$0xff] }
 0x210   : > { %900 = vmatpush.bf16.xpose.msra.mxu3 %v891_v51  ;;  %v1455_v51 = vld [vmem:[%s2491_s13 + $0x30] sm:$0xf] }
 0x213   : > { %v881_v52 = vpop.f32.mrf.mxu2 }
 0x214   : > { %v941_v53 = vpack.c.bf16 %v881_v52, %v881_v52  ;;  %v821_v54 = vpop.f32.mrf.mxu0  ;;  %v852_v55 = vpop.f32.mrf.mxu1  ;;  %v1478_v52 = vld [vmem:[%s2491_s13 + $0x30] sm:$0x30] }
 0x215   : > { %v1456_v54 = vor.u32 %v1478_v52, %v1455_v51 }
 0x216   : > { %v947_v57 = vsel %vm945_vm7, %v941_v53, 0 }
 0x217   : > { %956 = vmatpush.bf16.msrb.mxu0 %v947_v57  ;;  %1409 = vmatmul.msk.bf16.vlgmr.msra.gmra.mxu3 %vm744_vm0, %v885_v56  ;;  %v1477_v57 = vld [vmem:[%s2491_s13 + $0x28] sm:$0xff] }
 0x21b   : > { %v883_v58 = vpop.f32.mrf.mxu2 }
 0x21c   : > { %v1476_v58 = vld [vmem:[%s2491_s13 + $0x20] sm:$0xff] }
 0x29a   : > { %v902_v62 = vpop.f32.mrf.mxu3 }
 0x29b   : > { %v906_v63 = vmul.f32 0.19245009, %v902_v62  ;;  %v1474_v62 = vld [vmem:[%s2491_s13 + $0x10] sm:$0xff] }
 0x29d   : > { %v912_v1 = vsel %vm911_vm8, %v906_v63, -inf }
 0x29e   : > { %v914_v2 = vsel %vm913_vm9, %v912_v1, -inf }
 0x29f   : > { %915 = vmax.xlane.f32.xlu1 %v914_v2 }
 0x2a2   : > { %v904_v3 = vpop.f32.mrf.mxu3 }
 0x2a3   : > { %v1603_v3 = vld [vmem:[#allocation10] ss:$0 sm:$0xff] }
 0x312   : > { %v916_v4 = vpop.xlane.xlu1 %915 }
 0x313   : > { %v917_v5 = vsub.f32 %v912_v1, %v916_v4 }
 0x315   : > { %v918_v6 = vmul.f32 1.442695, %v917_v5 }
 0x317   : > { %1611 = vpow2.f32 %v918_v6  ;;  %v1604_v6 = vld [vmem:[#allocation11] ss:$0 sm:$0xff] }
 0x31d   : > { %v1612_v7 = vpop.eup %1611 }
 0x31e   : > { %v920_v9 = vsel %vm913_vm9, %v1612_v7, 0.0 }
 0x31f   : > { %921 = vadd.xlane.f32.xlu1 %v920_v9 }
 0x392   : > { %v922_v15 = vpop.xlane.xlu1 %921 }
 0x393   : > { %1613 = vrcp.f32 %v922_v15  ;;  %v934_v19 = vand.u32 2147483648, %v922_v15  ;;  %v932_v22 = vand.u32 2147483647, %v922_v15  ;;  %vm928_vm11 = vweird.f32 %v922_v15 }
 0x395   : > { %v935_v24 = vor.u32 1.1754944e-38, %v934_v19  ;;  %vm933_vm13 = vcmp.eq.f32.partialorder %v932_v22, 8.507059e+37  ;;  %v1606_v19 = vld [vmem:[%s2493_s29] ss:$0 sm:$0xff] }
 0x396   : > { %v1156_v22 = vld [vmem:[%s672_s0] sm:$0xff] }
 0x399   : > { %v1614_v16 = vpop.eup %1613 }
 0x39a   : > { %v924_v17 = vmul.f32 %v1614_v16, %v922_v15  ;;  %vm929_vm10 = vweird.f32 %v1614_v16 }
 0x39b   : > { %vm930_vm12 = vmor %vm928_vm11, %vm929_vm10 }
 0x39c   : > { %v925_v18 = vsub.f32 1.0, %v924_v17 }
 0x39e   : > { %v926_v20 = vmul.f32 %v1614_v16, %v925_v18 }
 0x3a0   : > { %v927_v23 = vadd.f32 %v1614_v16, %v926_v20 }
 0x3a2   : > { %v931_v25 = vsel %vm930_vm12, %v1614_v16, %v927_v23 }
 0x3a3   : > { %v936_v26 = vsel %vm933_vm13, %v935_v24, %v931_v25 }
 0x3a4   : > { %v937_v28 = vmul.f32 %v1612_v7, %v936_v26 }
 0x3a6   : > { %v939_v29 = vmul.f32 %v938_v27, %v937_v28 }
 0x3a8   : > { %v940_v30 = vpack.c.bf16 %v939_v29, %v939_v29 }
 0x3aa   : > { %1410 = vmatmul.msk.bf16.vlgmr.msrb.gmra.mxu0 %vm913_vm9, %v940_v30 }
 0x427   : > { %v958_v31 = vpop.f32.mrf.mxu0 }
 0x428   : > { %v962_v32 = vpack.c.bf16 %v958_v31, %v958_v31 }
 0x42a   : > { %1419 = vmatmul.msk.bf16.vlgmr.msrb.gmra.mxu1 %vm744_vm0, %v962_v32 }
 0x42f   : > { %v960_v33 = vpop.f32.mrf.mxu0 }
 0x4a7   : > { %v997_v35 = vpop.f32.mrf.mxu1 }
 0x4a8   : > { %v998_v37 = vadd.f32 %v1602_v34, %v997_v35 }
 0x4aa   : > { %v1002_v38 = vmul.f32 %v1001_v36, %v998_v37 }
 0x4ac   : > { %v2334_v39 = vadd.f32 %v1002_v38, %v2277_v0  ;;  %v1471_v0 = vld [vmem:[%s2490_s11 + $0x8] sm:$0x30] }
 0x4ad   : > { %v1427_v48 = vor.u32 %v1471_v0, %v1426_v47 }
 0x4ae   : > { %v1004_v40 = vsel %vm744_vm0, %v2334_v39, 0.0 }
 0x4af   : > { %v999_v41 = vpop.f32.mrf.mxu1  ;;  %1005 = vadd.xlane.f32.xlu2 %v1004_v40  ;;  %v1060_v49 = vand.u32 %v1427_v48, %v2299_v21  ;;  %v1141_v21 = vsel %vm804_vm3, %v1456_v54, 0 }
 0x4b0   : > { %1144 = vmatpush.bf16.msrb.mxu3 %v1141_v21 }
 0x4b1   : > { %1068 = vmatpush.bf16.msrb.mxu2 %v1060_v49 }
 0x4b4   : > { %1145 = vmatpush.bf16.msrb.mxu3 %v1477_v57 }
 0x4b5   : > { %1069 = vmatpush.bf16.msrb.mxu2 %v1470_v50 }
 0x4b8   : > { %1146 = vmatpush.bf16.msrb.mxu3 %v1476_v58 }
 0x522   : > { %v1006_v42 = vpop.xlane.xlu2 %1005 }
 0x523   : > { %v1007_v43 = vmul.f32 %v1006_v42, %v2281_v8 }
 0x525   : > { %v1008_v44 = vsub.f32 %v2334_v39, %v1007_v43 }
 0x527   : > { %v1009_v45 = vmul.f32 %v1008_v44, %v1008_v44 }
 0x529   : > { %v1010_v46 = vsel %vm744_vm0, %v1009_v45, 0.0 }
 0x52a   : > { %1011 = vadd.xlane.f32.xlu2 %v1010_v46 }
 0x59d   : > { %v1012_v53 = vpop.xlane.xlu2 %1011 }
 0x59e   : > { %v1013_v55 = vmul.f32 %v1012_v53, %v2281_v8  ;;  %v1475_v8 = vld [vmem:[%s2491_s13 + $0x18] sm:$0xff] }
 0x59f   : > { %1147 = vmatpush.bf16.msrb.mxu3 %v1475_v8 }
 0x5a0   : > { %v1014_v56 = vadd.f32 1e-05, %v1013_v55 }
 0x5a2   : > { %1615 = vrsqrt.f32 %v1014_v56  ;;  %vm1021_vm15 = vweird.f32 %v1014_v56 }
 0x5a3   : > { %1148 = vmatpush.bf16.msrb.mxu3 %v1474_v62 }
 0x5a7   : > { %1149 = vmatpush.bf16.msrb.mxu3 %v1473_v11 }
 0x5a8   : > { %v1616_v59 = vpop.eup %1615 }
 0x5a9   : > { %v1016_v60 = vmul.f32 %v1616_v59, %v1014_v56  ;;  %vm1022_vm14 = vweird.f32 %v1616_v59 }
 0x5aa   : > { %vm1023_vm1 = vmor %vm1021_vm15, %vm1022_vm14 }
 0x5ab   : > { %v1017_v61 = vmul.f32 %v1616_v59, %v1016_v60  ;;  %1150 = vmatpush.bf16.msrb.mxu3 %v1472_v12 }
 0x5ad   : > { %v1018_v63 = vmul.f32 0.5, %v1017_v61 }
 0x5af   : > { %v1019_v1 = vsub.f32 1.5, %v1018_v63 }
 0x5b1   : > { %v1020_v2 = vmul.f32 %v1616_v59, %v1019_v1 }
 0x5b3   : > { %v1024_v4 = vsel %vm1023_vm1, %v1616_v59, %v1020_v2 }
 0x5b4   : > { %v1025_v5 = vmul.f32 %v1024_v4, %v1008_v44 }
 0x5b6   : > { %v1030_v7 = vmul.f32 %v1603_v3, %v1025_v5 }
 0x5b8   : > { %v1035_v9 = vadd.f32 %v1604_v6, %v1030_v7 }
 0x5ba   : > { %v1036_v10 = vpack.c.bf16 %v1035_v9, %v1035_v9 }
 0x5bc   : > { %1428 = vmatmul.msk.bf16.vlgmr.msrb.gmra.mxu2 %vm744_vm0, %v1036_v10 }
 0x63f   : > { %v1071_v14 = vpop.f32.mrf.mxu2 }
 0x640   : > { %v1072_v15 = vadd.f32 %v1605_v13, %v1071_v14 }
 0x642   : > { %v1075_v16 = vmax.f32 %v1072_v15, 0.0 }
 0x644   : > { %v1076_v17 = vpack.c.bf16 %v1075_v16, %v1075_v16 }
 0x646   : > { %1457 = vmatmul.msk.bf16.vlgmr.msrb.gmra.mxu3 %vm1136_vm2, %v1076_v17 }
 0x647   : > { %v1073_v18 = vpop.f32.mrf.mxu2 }
 0x6c9   : > { %v1152_v20 = vpop.f32.mrf.mxu3 }
 0x6ca   : > { %v1153_v23 = vadd.f32 %v1606_v19, %v1152_v20 }
 0x6cc   : > { %v1157_v24 = vmul.f32 %v1156_v22, %v1153_v23 }
 0x6ce   : > { %v1158_v25 = vadd.f32 %v1157_v24, %v2334_v39 }
 0x6d0   : > { %1159 = vst.msk [vmem:[%s737_s28] sm:$0xff] %vm744_vm0, %v1158_v25 }
 0x6d1   : > { %v1154_v26 = vpop.f32.mrf.mxu3 }
 0x6d2   : > { %1914 = shalt.err (!%p1911_p8)
}
 0x6d3   : > { %1509 = dma.vmem_to_hbm [thread:$0]  (%p2141_p0), %s1174_s5, 128, %s1176_s20, %s1161_s18  }
 0x6d4 PF: > { %s2496_s24 = sld [smem:[#allocation23_spill]] }
 0x6d5   : > { %s2498_s1 = sld [smem:[#allocation25_spill]] }
 0x6da   : > { %s1187_s30 = sand.u32 1, %s2496_s24  }
 0x6db   : > { %p2499_p10 = scmp.ge.s32.totalorder %s2498_s1, 2  ;;  %s1188_s17 = scalar_lea.sflag [#allocation4], %s1187_s30 }
 0x6dd   : > { %p1541_p7 = pnand %p2499_p10, %p2147_p4 }
 0x6df   : > { %p1542_p3 = pneg %p1541_p7 }
 0x6e1   : > { %1952 = dma.done.wait (%p1542_p3), %s1188_s17, 128  }
 0x6e2   : > { %1954 = vsyncadd (%p1542_p3), %s1188_s17, 4294967168  ;;  %s2500_s27 = sld [smem:[#allocation26_spill]]  ;;  %s2503_s24 = smov %s1961_s25 }
 0x6e3   : > { %s2501_s0 = sld [smem:[#allocation24_spill]] }
 0x6e4   : > { %s2502_s26 = sld [smem:[#allocation27_spill]] }
 0x6e8   : > { %p31_p6 = scmp.ge.s32.totalorder %s2500_s27, 4  }
 0x6e9   : > { %s2504_s25 = smov %s2501_s0 }
 0x6ea   :  { %33 = sbr.rel (!%p31_p6) target bundleno = 18 (0x12), region = 181 }
 0x6ef   :  { %1194 = vsyncpa [#allocation3], 1 }
 0x6f0   :  { %1196 = vsyncpa [#allocation3 + $0x1], 1 }
 0x6f1   :  { %1197 = vsyncpa [#allocation6], 1 }
 0x6f2   :  { %1198 = vsyncpa [#allocation9], 1 }
 0x6f3   :  { %1199 = vsyncpa [#allocation12], 1 }
 0x6f4   :  { %1200 = vsyncpa [#allocation4], 1 }
 0x6f5   :  { %1202 = vsyncpa [#allocation4 + $0x1], 1 }

</bundles_post_ra>
